<compile_context>
chip_gen: v7x
topology: tpu7x:2x2x1
jax: 0.10.0
libtpu: 0.0.40
codegen_flags: <defaults>
</compile_context>

<pallas_src>
import jax
import jax.numpy as jnp
from jax import lax
from jax.experimental import pallas as pl
from jax.experimental.pallas import tpu as pltpu


D_IN, D_H1, D_H2, D_OUT = 512, 64, 8, 2
D_H2_PAD = 128       # lane-dense width for the 2nd/3rd matmuls (zeros beyond 8)
TILE_B_MAX = 2048    # f32 x tile = 4 MiB; double-buffered + temps ~12 MiB VMEM
VMEM_LIMIT = 32 * 1024 * 1024


def _round_up(n, m):
    return ((n + m - 1) // m) * m


def _mlp_head_kernel(x_ref, w1_ref, b1_ref, w2_ref, b2_ref, w3t_ref, b3t_ref,
                     o_ref):
    # x_ref: (tile_b, 512) f32        w1: (512, 64) bf16     b1: (1, 64) f32
    # w2: (64, 128) f32 (padded)      b2: (1, 128) f32 (padded)
    # w3t: (2, 128) f32 (padded, pre-transposed)   b3t: (2, 1) f32
    # o_ref: (2, tile_b) f32  (batch on the lane axis -> unmasked, dense store)

    # Linear(512 -> 64) + ReLU.  Cast x -> bf16 in-kernel (rides on VPU slack;
    # no extra HBM pass), MXU accumulates in f32.  Dropout = identity (eval).
    x_bf = x_ref[...].astype(jnp.bfloat16)
    h1 = jnp.dot(x_bf, w1_ref[...], preferred_element_type=jnp.float32)
    h1 = jnp.maximum(h1 + b1_ref[...], 0.0)

    # Linear(64 -> 8) + ReLU, padded to 128 output lanes (padded cols stay 0).
    h2 = jnp.dot(h1, w2_ref[...], preferred_element_type=jnp.float32)
    h2 = jnp.maximum(h2 + b2_ref[...], 0.0)

    # Linear(8 -> 2), computed directly in transposed orientation:
    #   o[n, b] = sum_k w3t[n, k] * h2[b, k]   ('nk,bk->nb', same as Q @ K^T)
    # -> lane-dense (2, tile_b) result, no in-kernel transpose needed.
    out_t = lax.dot_general(w3t_ref[...], h2, (((1,), (1,)), ((), ())),
                            preferred_element_type=jnp.float32)
    o_ref[...] = (out_t + b3t_ref[...]).astype(o_ref.dtype)


def _choose_tiling(B):
    """Return (tile_b, num_tiles, b_pad) honoring the (8,128) layout rules."""
    b8 = _round_up(B, 8)
    if b8 <= 128:
        # Tiny batch: single grid step, block == full array (any shape legal).
        return b8, 1, b8
    # >=2 steps so v7x megacore can split the batch; tile_b must be a multiple
    # of 128 (it is the lane axis of the transposed output block).
    num_tiles = max(2, pl.cdiv(b8, TILE_B_MAX))
    tile_b = _round_up(pl.cdiv(b8, num_tiles), 128)
    num_tiles = pl.cdiv(b8, tile_b)          # drop empty trailing tiles
    return tile_b, num_tiles, tile_b * num_tiles


def face_classifier_head(x, params):
    """x: [B, 512] float32. params: dict of w1,b1,w2,b2,w3,b3 (f32, [in,out])."""
    B = x.shape[0]
    x = x.astype(jnp.float32)

    # Host-side (one-time, tiny) parameter prep.
    w1 = params["w1"].astype(jnp.bfloat16)                       # (512, 64)
    b1 = jnp.asarray(params["b1"], jnp.float32).reshape(1, D_H1)
    w2 = jnp.zeros((D_H1, D_H2_PAD), jnp.float32).at[:, :D_H2].set(
        jnp.asarray(params["w2"], jnp.float32))
    b2 = jnp.zeros((1, D_H2_PAD), jnp.float32).at[:, :D_H2].set(
        jnp.asarray(params["b2"], jnp.float32).reshape(1, D_H2))
    w3t = jnp.zeros((D_OUT, D_H2_PAD), jnp.float32).at[:, :D_H2].set(
        jnp.asarray(params["w3"], jnp.float32).T)                # (2, 128)
    b3t = jnp.asarray(params["b3"], jnp.float32).reshape(D_OUT, 1)

    tile_b, num_tiles, b_pad = _choose_tiling(B)
    if b_pad != B:                       # skip the pad pass when not needed
        x = jnp.pad(x, ((0, b_pad - B), (0, 0)))
    grid = (num_tiles,)

    const = lambda shape: pl.BlockSpec(shape, lambda i: (0, 0))  # resident

    flops = 2 * b_pad * (D_IN * D_H1 + D_H1 * D_H2_PAD + D_H2_PAD * D_OUT)
    bytes_accessed = (b_pad * D_IN * 4                           # x (f32)
                      + D_IN * D_H1 * 2                          # w1 (bf16)
                      + (D_H1 + (D_H1 + 1) * D_H2_PAD
                         + (D_H2_PAD + 1) * D_OUT) * 4           # small params
                      + D_OUT * b_pad * 4)                       # output (f32)

    out_t = pl.pallas_call(
        _mlp_head_kernel,
        out_shape=jax.ShapeDtypeStruct((D_OUT, b_pad), jnp.float32),
        grid_spec=pltpu.PrefetchScalarGridSpec(
            num_scalar_prefetch=0,
            grid=grid,
            in_specs=[
                pl.BlockSpec((tile_b, D_IN), lambda i: (i, 0)),   # x: streamed
                const((D_IN, D_H1)), const((1, D_H1)),            # w1, b1
                const((D_H1, D_H2_PAD)), const((1, D_H2_PAD)),    # w2, b2
                const((D_OUT, D_H2_PAD)), const((D_OUT, 1)),      # w3t, b3t
            ],
            out_specs=pl.BlockSpec((D_OUT, tile_b), lambda i: (0, i)),
        ),
        compiler_params=pltpu.CompilerParams(
            dimension_semantics=("parallel",),
            vmem_limit_bytes=VMEM_LIMIT),
        cost_estimate=pl.CostEstimate(
            flops=flops, transcendentals=0, bytes_accessed=bytes_accessed),
    )(x, w1, b1, w2, b2, w3t, b3t)

    # (2, b_pad) -> (B, 2): slice+transpose touches only 8 B/row (negligible).
    return out_t[:, :B].T


def init_params(key):
    """Deterministic synthetic parameters with the module's shapes."""
    ks = jax.random.split(key, 6)

    def lin(kw, kb, fan_in, fan_out):
        bound = 1.0 / jnp.sqrt(fan_in)
        w = jax.random.uniform(kw, (fan_in, fan_out), jnp.float32, -bound, bound)
        b = jax.random.uniform(kb, (1, fan_out), jnp.float32, -bound, bound)
        return w, b

    w1, b1 = lin(ks[0], ks[1], D_IN, D_H1)
    w2, b2 = lin(ks[2], ks[3], D_H1, D_H2)
    w3, b3 = lin(ks[4], ks[5], D_H2, D_OUT)
    return {"w1": w1, "b1": b1, "w2": w2, "b2": b2, "w3": w3, "b3": b3}


def _reference(x, p):
    """Same math as the kernel (bf16 first layer, f32 accumulation elsewhere)."""
    h1 = jnp.maximum(
        jnp.dot(x.astype(jnp.bfloat16), p["w1"].astype(jnp.bfloat16),
                preferred_element_type=jnp.float32) + p["b1"], 0.0)
    h2 = jnp.maximum(
        jnp.dot(h1, p["w2"], preferred_element_type=jnp.float32) + p["b2"], 0.0)
    return jnp.dot(h2, p["w3"], preferred_element_type=jnp.float32) + p["b3"]


if __name__ == "__main__":
    key = jax.random.PRNGKey(0)
    k_x1, k_x2, k_p = jax.random.split(key, 3)
    params = init_params(k_p)

    # Small batch -> single-tile path (block == full array).
    B1 = 8
    x1 = jax.random.normal(k_x1, (B1, D_IN), jnp.float32)
    out1 = jax.block_until_ready(face_classifier_head(x1, params))
    ref1 = _reference(x1, params)
    assert out1.shape == (B1, D_OUT)
    assert jnp.allclose(out1, ref1, atol=2e-3, rtol=2e-3)

    # Ragged batch -> multi-tile pipelined path (grid=(2,), padded rows sliced).
    B2 = 200
    x2 = jax.random.normal(k_x2, (B2, D_IN), jnp.float32)
    out2 = jax.block_until_ready(face_classifier_head(x2, params))
    ref2 = _reference(x2, params)
    assert out2.shape == (B2, D_OUT)
    assert jnp.allclose(out2, ref2, atol=2e-3, rtol=2e-3)

    print("KERNEL_OK")
</pallas_src>

<mosaic_0001>
module attributes {stable_mosaic.version = 11 : i64} {
  func.func @_mlp_head_kernel(%arg0: i32, %arg1: memref<8x512xf32, #tpu.memory_space<vmem>>, %arg2: memref<512x64xbf16, #tpu.memory_space<vmem>>, %arg3: memref<1x64xf32, #tpu.memory_space<vmem>>, %arg4: memref<64x128xf32, #tpu.memory_space<vmem>>, %arg5: memref<1x128xf32, #tpu.memory_space<vmem>>, %arg6: memref<2x128xf32, #tpu.memory_space<vmem>>, %arg7: memref<2x1xf32, #tpu.memory_space<vmem>>, %arg8: memref<2x8xf32, #tpu.memory_space<vmem>>) attributes {dimension_semantics = [#tpu.dimension_semantics<parallel>], iteration_bounds = array<i64: 1>, scalar_prefetch = 0 : i64, scratch_operands = 0 : i64, tpu.core_type = #tpu.core_type<tc>, window_params = [{transform_indices = @transform_0, window_bounds = array<i64: 8, 512>}, {pipeline_mode = #tpu.pipeline_mode<synchronous>, transform_indices = @transform_1, window_bounds = array<i64: 512, 64>}, {pipeline_mode = #tpu.pipeline_mode<synchronous>, transform_indices = @transform_2, window_bounds = array<i64: 1, 64>}, {pipeline_mode = #tpu.pipeline_mode<synchronous>, transform_indices = @transform_3, window_bounds = array<i64: 64, 128>}, {pipeline_mode = #tpu.pipeline_mode<synchronous>, transform_indices = @transform_4, window_bounds = array<i64: 1, 128>}, {pipeline_mode = #tpu.pipeline_mode<synchronous>, transform_indices = @transform_5, window_bounds = array<i64: 2, 128>}, {pipeline_mode = #tpu.pipeline_mode<synchronous>, transform_indices = @transform_6, window_bounds = array<i64: 2, 1>}, {transform_indices = @transform_7, window_bounds = array<i64: 2, 8>}]} {
    %c0 = arith.constant 0 : index
    %c0_0 = arith.constant 0 : index
    %0 = vector.load %arg1[%c0, %c0_0] : memref<8x512xf32, #tpu.memory_space<vmem>>, vector<8x512xf32>
    %1 = arith.truncf %0 : vector<8x512xf32> to vector<8x512xbf16>
    %c0_1 = arith.constant 0 : index
    %c0_2 = arith.constant 0 : index
    %2 = vector.load %arg2[%c0_1, %c0_2] : memref<512x64xbf16, #tpu.memory_space<vmem>>, vector<512x64xbf16>
    %cst = arith.constant dense<0.000000e+00> : vector<8x64xf32>
    %3 = tpu.matmul %1, %2, %cst {dimension_numbers = #tpu.dot_dimension_numbers<[1], [0], [0], [1], [0, 0, 1, 1], [], []>} : vector<8x512xbf16>, vector<512x64xbf16>, vector<8x64xf32> -> vector<8x64xf32>
    %c0_3 = arith.constant 0 : index
    %c0_4 = arith.constant 0 : index
    %4 = vector.load %arg3[%c0_3, %c0_4] : memref<1x64xf32, #tpu.memory_space<vmem>>, vector<1x64xf32>
    %5 = vector.broadcast %4 : vector<1x64xf32> to vector<8x64xf32>
    %6 = arith.addf %3, %5 : vector<8x64xf32>
    %cst_5 = arith.constant 0.000000e+00 : f32
    %7 = vector.broadcast %cst_5 : f32 to vector<8x64xf32>
    %8 = arith.maximumf %6, %7 : vector<8x64xf32>
    %c0_6 = arith.constant 0 : index
    %c0_7 = arith.constant 0 : index
    %9 = vector.load %arg4[%c0_6, %c0_7] : memref<64x128xf32, #tpu.memory_space<vmem>>, vector<64x128xf32>
    %cst_8 = arith.constant dense<0.000000e+00> : vector<8x128xf32>
    %10 = tpu.matmul %8, %9, %cst_8 {dimension_numbers = #tpu.dot_dimension_numbers<[1], [0], [0], [1], [0, 0, 1, 1], [], []>} : vector<8x64xf32>, vector<64x128xf32>, vector<8x128xf32> -> vector<8x128xf32>
    %c0_9 = arith.constant 0 : index
    %c0_10 = arith.constant 0 : index
    %11 = vector.load %arg5[%c0_9, %c0_10] : memref<1x128xf32, #tpu.memory_space<vmem>>, vector<1x128xf32>
    %12 = vector.broadcast %11 : vector<1x128xf32> to vector<8x128xf32>
    %13 = arith.addf %10, %12 : vector<8x128xf32>
    %cst_11 = arith.constant 0.000000e+00 : f32
    %14 = vector.broadcast %cst_11 : f32 to vector<8x128xf32>
    %15 = arith.maximumf %13, %14 : vector<8x128xf32>
    %c0_12 = arith.constant 0 : index
    %c0_13 = arith.constant 0 : index
    %16 = vector.load %arg6[%c0_12, %c0_13] : memref<2x128xf32, #tpu.memory_space<vmem>>, vector<2x128xf32>
    %cst_14 = arith.constant dense<0.000000e+00> : vector<2x8xf32>
    %17 = tpu.matmul %16, %15, %cst_14 {dimension_numbers = #tpu.dot_dimension_numbers<[1], [1], [0], [0], [0, 0, 1, 0], [], []>} : vector<2x128xf32>, vector<8x128xf32>, vector<2x8xf32> -> vector<2x8xf32>
    %c0_15 = arith.constant 0 : index
    %c0_16 = arith.constant 0 : index
    %18 = vector.load %arg7[%c0_15, %c0_16] : memref<2x1xf32, #tpu.memory_space<vmem>>, vector<2x1xf32>
    %19 = vector.broadcast %18 : vector<2x1xf32> to vector<2x8xf32>
    %20 = arith.addf %17, %19 : vector<2x8xf32>
    %c0_17 = arith.constant 0 : index
    %c0_18 = arith.constant 0 : index
    %21 = vector.load %arg8[%c0_17, %c0_18] : memref<2x8xf32, #tpu.memory_space<vmem>>, vector<2x8xf32>
    tpu.vector_store %arg8[%c0_17, %c0_18], %20 {strides = array<i32>} : memref<2x8xf32, #tpu.memory_space<vmem>>, vector<2x8xf32>,
    return
  }
  func.func @transform_0(%arg0: i32) -> (i32, i32) {
    %c0_i32 = arith.constant 0 : i32
    %c0_i32_0 = arith.constant 0 : i32
    return %arg0, %c0_i32 : i32, i32
  }
  func.func @transform_1(%arg0: i32) -> (i32, i32) {
    %c0_i32 = arith.constant 0 : i32
    %c0_i32_0 = arith.constant 0 : i32
    %c0_i32_1 = arith.constant 0 : i32
    return %c0_i32, %c0_i32_0 : i32, i32
  }
  func.func @transform_2(%arg0: i32) -> (i32, i32) {
    %c0_i32 = arith.constant 0 : i32
    %c0_i32_0 = arith.constant 0 : i32
    %c0_i32_1 = arith.constant 0 : i32
    return %c0_i32, %c0_i32_0 : i32, i32
  }
  func.func @transform_3(%arg0: i32) -> (i32, i32) {
    %c0_i32 = arith.constant 0 : i32
    %c0_i32_0 = arith.constant 0 : i32
    %c0_i32_1 = arith.constant 0 : i32
    return %c0_i32, %c0_i32_0 : i32, i32
  }
  func.func @transform_4(%arg0: i32) -> (i32, i32) {
    %c0_i32 = arith.constant 0 : i32
    %c0_i32_0 = arith.constant 0 : i32
    %c0_i32_1 = arith.constant 0 : i32
    return %c0_i32, %c0_i32_0 : i32, i32
  }
  func.func @transform_5(%arg0: i32) -> (i32, i32) {
    %c0_i32 = arith.constant 0 : i32
    %c0_i32_0 = arith.constant 0 : i32
    %c0_i32_1 = arith.constant 0 : i32
    return %c0_i32, %c0_i32_0 : i32, i32
  }
  func.func @transform_6(%arg0: i32) -> (i32, i32) {
    %c0_i32 = arith.constant 0 : i32
    %c0_i32_0 = arith.constant 0 : i32
    %c0_i32_1 = arith.constant 0 : i32
    return %c0_i32, %c0_i32_0 : i32, i32
  }
  func.func @transform_7(%arg0: i32) -> (i32, i32) {
    %c0_i32 = arith.constant 0 : i32
    %c0_i32_0 = arith.constant 0 : i32
    return %c0_i32, %arg0 : i32, i32
  }
}

</mosaic_0001>

<bundles_post_ra>
// kernel: tpu_custom_call.1
= control target key start
LH: loop header
LB: loop body
LE: loop exit
PB: predicated region body
PF: predicated region fallthrough
CT: control target
= control target key end

     0   :  { %v751_v39 = vmov 0.0|0.0   ;;  %s952_s0 = inlined_call_operand.vmem [shape: f32[8,512], index: 0, kind: input, shape index: {}]   ;;  %s953_s1 = inlined_call_operand.vmem [shape: bf16[512,64], index: 1, kind: input, shape index: {}]   ;;  %s954_s2 = inlined_call_operand.vmem [shape: f32[1,64], index: 2, kind: input, shape index: {}]   ;;  %s955_s3 = inlined_call_operand.vmem [shape: f32[64,128], index: 3, kind: input, shape index: {}]   ;;  %s956_s4 = inlined_call_operand.vmem [shape: f32[1,128], index: 4, kind: input, shape index: {}]   ;;  %s957_s5 = inlined_call_operand.vmem [shape: f32[2,128], index: 5, kind: input, shape index: {}]   ;;  %s958_s6 = inlined_call_operand.vmem [shape: f32[2,1], index: 6, kind: input, shape index: {}]   ;;  %s959_s7 = inlined_call_operand.hbm [shape: f32[2,8], index: 7, kind: output, shape index: {}]  }
   0x1   :  { %v695_v0 = vld [vmem:[%s953_s1 + $0x40] sm:$0xff]   ;;  %v699_v4 = vld [vmem:[%s953_s1 + $0x48] sm:$0xff]   ;;  %v703_v8 = vld [vmem:[%s953_s1 + $0x50] sm:$0xff]  }
   0x2   :  { %v696_v1 = vld [vmem:[%s953_s1 + $0xc0] sm:$0xff]   ;;  %598 = vmatprep.subr.bf16.mxu0 %v695_v0  ;;  %v700_v5 = vld [vmem:[%s953_s1 + $0xc8] sm:$0xff]   ;;  %v704_v9 = vld [vmem:[%s953_s1 + $0xd0] sm:$0xff]  }
   0x3   :  { %v697_v2 = vld [vmem:[%s953_s1] sm:$0xff]   ;;  %620 = vmatprep.subr.bf16.mxu1 %v696_v1  ;;  %v701_v6 = vld [vmem:[%s953_s1 + $0x8] sm:$0xff]   ;;  %v705_v10 = vld [vmem:[%s953_s1 + $0x10] sm:$0xff]  }
   0x4   :  { %v698_v3 = vld [vmem:[%s953_s1 + $0x80] sm:$0xff]   ;;  %599 = vmatpush3.bf16.msra.mxu0 %v697_v2  ;;  %v702_v7 = vld [vmem:[%s953_s1 + $0x88] sm:$0xff]   ;;  %v706_v11 = vld [vmem:[%s953_s1 + $0x90] sm:$0xff]  }
   0x5   :  { %621 = vmatpush3.bf16.msra.mxu1 %v698_v3  ;;  %600 = vmatprep.subr.bf16.mxu0 %v699_v4  ;;  %v707_v12 = vld [vmem:[%s953_s1 + $0x58] sm:$0xff]   ;;  %v711_v16 = vld [vmem:[%s953_s1 + $0x60] sm:$0xff]   ;;  %v715_v20 = vld [vmem:[%s953_s1 + $0x68] sm:$0xff]  }
   0x6   :  { %622 = vmatprep.subr.bf16.mxu1 %v700_v5  ;;  %v708_v13 = vld [vmem:[%s953_s1 + $0xd8] sm:$0xff]   ;;  %v712_v17 = vld [vmem:[%s953_s1 + $0xe0] sm:$0xff]   ;;  %v716_v21 = vld [vmem:[%s953_s1 + $0xe8] sm:$0xff]  }
   0x7   :  { %v709_v14 = vld [vmem:[%s953_s1 + $0x18] sm:$0xff]   ;;  %v713_v18 = vld [vmem:[%s953_s1 + $0x20] sm:$0xff]   ;;  %v717_v22 = vld [vmem:[%s953_s1 + $0x28] sm:$0xff]  }
   0x8   :  { %601 = vmatpush3.bf16.msra.mxu0 %v701_v6  ;;  %v710_v15 = vld [vmem:[%s953_s1 + $0x98] sm:$0xff]   ;;  %v714_v19 = vld [vmem:[%s953_s1 + $0xa0] sm:$0xff]   ;;  %v718_v23 = vld [vmem:[%s953_s1 + $0xa8] sm:$0xff]  }
   0x9   :  { %623 = vmatpush3.bf16.msra.mxu1 %v702_v7  ;;  %602 = vmatprep.subr.bf16.mxu0 %v703_v8  ;;  %v719_v24 = vld [vmem:[%s953_s1 + $0x70] sm:$0xff]   ;;  %v723_v28 = vld [vmem:[%s953_s1 + $0x78] sm:$0xff]   ;;  %v29_v32 = vld [vmem:[%s952_s0 + $0x8] sm:$0xff] }
   0xa   :  { %624 = vmatprep.subr.bf16.mxu1 %v704_v9  ;;  %v720_v25 = vld [vmem:[%s953_s1 + $0xf0] sm:$0xff]   ;;  %v724_v29 = vld [vmem:[%s953_s1 + $0xf8] sm:$0xff]   ;;  %v28_v34 = vld [vmem:[%s952_s0] sm:$0xff]  ;;  %v33_v35 = vpack.c.bf16 %v29_v32, %v29_v32 }
   0xb   :  { %v721_v26 = vld [vmem:[%s953_s1 + $0x30] sm:$0xff]   ;;  %v725_v30 = vld [vmem:[%s953_s1 + $0x38] sm:$0xff]   ;;  %v32_v37 = vpack.c.bf16 %v28_v34, %v28_v34  ;;  %v380_v40 = vld [vmem:[%s955_s3] sm:$0xff] }
   0xc   :  { %603 = vmatpush3.bf16.msra.mxu0 %v705_v10  ;;  %v722_v27 = vld [vmem:[%s953_s1 + $0xb0] sm:$0xff]   ;;  %v726_v31 = vld [vmem:[%s953_s1 + $0xb8] sm:$0xff]   ;;  %v381_v41 = vld [vmem:[%s955_s3 + $0x8] sm:$0xff] }
   0xd   :  { %625 = vmatpush3.bf16.msra.mxu1 %v706_v11  ;;  %604 = vmatprep.subr.bf16.mxu0 %v707_v12  ;;  %v31_v33 = vld [vmem:[%s952_s0 + $0x18] sm:$0xff]  ;;  %v30_v38 = vld [vmem:[%s952_s0 + $0x10] sm:$0xff]  ;;  %v678_v43 = vpack.c.bf16 %v381_v41, %v380_v40 }
   0xe   :  { %626 = vmatprep.subr.bf16.mxu1 %v708_v13  ;;  %v35_v36 = vpack.c.bf16 %v31_v33, %v31_v33  ;;  %v34_v42 = vpack.c.bf16 %v30_v38, %v30_v38  ;;  %v382_v44 = vld [vmem:[%s955_s3 + $0x10] sm:$0xff]  ;;  %v383_v45 = vld [vmem:[%s955_s3 + $0x18] sm:$0xff] }
  0x10   :  { %605 = vmatpush3.bf16.msra.mxu0 %v709_v14 }
  0x11   :  { %627 = vmatpush3.bf16.msra.mxu1 %v710_v15  ;;  %606 = vmatprep.subr.bf16.mxu0 %v711_v16 }
  0x12   :  { %628 = vmatprep.subr.bf16.mxu1 %v712_v17 }
  0x14   :  { %607 = vmatpush3.bf16.msra.mxu0 %v713_v18 }
  0x15   :  { %629 = vmatpush3.bf16.msra.mxu1 %v714_v19  ;;  %608 = vmatprep.subr.bf16.mxu0 %v715_v20 }
  0x16   :  { %630 = vmatprep.subr.bf16.mxu1 %v716_v21 }
  0x18   :  { %609 = vmatpush3.bf16.msra.mxu0 %v717_v22 }
  0x19   :  { %631 = vmatpush3.bf16.msra.mxu1 %v718_v23  ;;  %610 = vmatprep.subr.bf16.mxu0 %v719_v24 }
  0x1a   :  { %632 = vmatprep.subr.bf16.mxu1 %v720_v25 }
  0x1c   :  { %611 = vmatpush3.bf16.msra.mxu0 %v721_v26 }
  0x1d   :  { %633 = vmatpush3.bf16.msra.mxu1 %v722_v27  ;;  %612 = vmatprep.subr.bf16.mxu0 %v723_v28 }
  0x1e   :  { %634 = vmatprep.subr.bf16.mxu1 %v724_v29 }
  0x20   :  { %613 = vmatpush3.bf16.msra.mxu0 %v725_v30 }
  0x21   :  { %635 = vmatpush3.bf16.msra.mxu1 %v726_v31  ;;  %677 = vmatprep.subr.bf16.mxu0 %v751_v39 }
  0x22   :  { %12 = vsyncpa [#allocation3], 0  ;;  %331 = vmatprep.mubr.bf16.mxu0 %v33_v35  ;;  %371 = vmatprep.mubr.bf16.mxu1 %v35_v36  ;;  %v681_v46 = vpack.c.bf16 %v383_v45, %v382_v44  ;;  %v384_v47 = vld [vmem:[%s955_s3 + $0x20] sm:$0xff]  ;;  %v385_v48 = vld [vmem:[%s955_s3 + $0x28] sm:$0xff]  ;;  %vm752_vm0 = vmmov 0   ;;  %v753_v53 = vmov 0.0  }
  0x23   :  { %332 = vmatmul.mubr.bf16.vlgmr.msra.gmra.mrb[0].mxu0 %v32_v37  ;;  %v684_v49 = vpack.c.bf16 %v385_v48, %v384_v47  ;;  %v386_v50 = vld [vmem:[%s955_s3 + $0x30] sm:$0xff]  ;;  %v387_v51 = vld [vmem:[%s955_s3 + $0x38] sm:$0xff]  ;;  %672 = vmatprep.subr.mxu1 %v753_v53  ;;  %v563_v56 = vld [vmem:[%s954_s2] ss:$0 sm:$0xff]  ;;  %vm395_vm1 = vcmask 523264   ;;  %v754_v5 = vmov 0  }
  0x24   :  { %372 = vmatmul.mubr.bf16.vlgmr.msra.gmra.mrb[0].mxu1 %v34_v42  ;;  %679 = vmatpush3.bf16.msra.mxu0 %v678_v43  ;;  %v687_v52 = vpack.c.bf16 %v387_v51, %v386_v50  ;;  %v471_v4 = vld [vmem:[%s958_s6] sm:$0x3]  ;;  %s755_s24 = smov [#allocation2]   ;;  %vm547_vm2 = vcmask 58368  }
  0x25   :  { %680 = vmatprep.subr.bf16.mxu0 %v751_v39  ;;  %669 = vmatprep.mubr.msk.f32.mxu0 %vm752_vm0, %v753_v53  ;;  %v596_v6 = vld [vmem:[%s956_s4] ss:$0 sm:$0xff]  ;;  %s555_s6 = sshll.u32 %s755_s24, 4  ;;  %s556_s6 = int_to_ptr.vmem [resolvable:$true] %s555_s6 }
  0x26   :  { %674 = vmatprep.mubr.msk.f32.mxu1 %vm752_vm0, %v753_v53  ;;  %694 = vset.pattern.permute.xlu0 %v754_v5  ;;  %v470_v11 = vld [vmem:[%s957_s5] sm:$0x3]  ;;  %s727_s4 = scalar_lea.vmem %s556_s6, 32  ;;  %p732_p1 = scmp.lt.s32.totalorder %s556_s6, %s556_s6 }
  0x27   :  { %474 = vperm.xlu0 %694, %v471_v4   ;;  %p728_p0 = scmp.ne.s32.totalorder %s556_s6, %s727_s4  ;;  %p733_p2 = scmp.lt.s32.totalorder %s727_s4, %s727_s4 }
  0x28   :  { %682 = vmatpush3.bf16.msra.mxu0 %v681_v46 }
  0x29   :  { %683 = vmatprep.subr.bf16.mxu0 %v751_v39  ;;  %p734_p3 = por %p733_p2, %p732_p1 }
  0x2b   :  { %p735_p4 = pnand %p734_p3, %p728_p0 }
  0x2c   :  { %685 = vmatpush3.bf16.msra.mxu0 %v684_v49 }
  0x2d   :  { %686 = vmatprep.subr.bf16.mxu0 %v751_v39 }
  0x30   :  { %688 = vmatpush3.bf16.msra.mxu0 %v687_v52 }
  0xa6   :  { %v475_v12 = vpop.permute.xlu0 %474 }
  0xf6   :  { %v614_v54 = vpop.f32.mrb[0].mxu0 }
  0xf7   :  { %v636_v55 = vpop.f32.mrb[0].mxu1  ;;  %v615_v57 = vpop.f32.mrb[1].mxu0 }
  0xf8   :  { %v637_v58 = vpop.f32.mrb[1].mxu1  ;;  %v616_v59 = vadd.f32 %v615_v57, %v614_v54  ;;  %v617_v61 = vpop.f32.mrb[2].mxu0 }
  0xf9   :  { %v638_v60 = vadd.f32 %v637_v58, %v636_v55  ;;  %v639_v62 = vpop.f32.mrb[2].mxu1  ;;  %v618_v63 = vpop.f32.mrb[3].mxu0 }
  0xfa   :  { %v640_v0 = vpop.f32.mrb[3].mxu1  ;;  %v334_v1 = vadd.f32 %v616_v59, %v563_v56 }
  0xfc   :  { %v374_v2 = vadd.f32 %v638_v60, %v334_v1 }
  0xfe   :  { %v379_v3 = vmax.f32 %v374_v2, 0.0 }
 0x100   :  { %670 = vmatmul.mubr.msk.f32.vlgmr.msra.gmra.mrb[4].mxu0 %vm395_vm1, %v379_v3 }
 0x1d3   :  { %v465_v7 = vpop.f32.mrb[4].mxu0 }
 0x1d4   :  { %v466_v8 = vadd.f32 %v596_v6, %v465_v7  ;;  %v671_v9 = vpop.f32.mrb[5].mxu0 }
 0x1d6   :  { %v469_v10 = vmax.f32 %v466_v8, 0.0 }
 0x1d8   :  { %673 = vmatpush3.xpose.msra.mxu1 %v469_v10 }
 0x1db   :  { %675 = vmatmul.mubr.f32.vlgmr.msra.gmra.mrb[4].mxu1 %v470_v11 }
 0x2ae   :  { %v543_v13 = vpop.f32.mrb[4].mxu1 }
 0x2af   :  { %v544_v14 = vadd.f32 %v543_v13, %v475_v12  ;;  %v676_v15 = vpop.f32.mrb[5].mxu1 }
 0x2b1   :  { %548 = vst.msk [vmem:[#allocation2] sm:$0x3] %vm547_vm2, %v544_v14 }
 0x2b2   :  { %738 = shalt.err (!%p735_p4)
}
 0x2b3   :  { %s739_s5 = scalar_lea.hbm %s959_s7, 32 }
 0x2b4   :  { %p740_p5 = scmp.ne.s32.totalorder %s959_s7, %s739_s5  ;;  %p743_p6 = scmp.lt.u32.totalorder %s739_s5, %s959_s7 }
 0x2b6   :  { %p745_p7 = pnand %p743_p6, %p740_p5 }
 0x2b8   :  { %748 = shalt.err (!%p745_p7)
}
 0x2b9   :  { %558 = dma.vmem_to_hbm [thread:$0]  %s556_s6, 32, %s959_s7, [#allocation3]  }
 0x2ba   :  { %749 = dma.done.wait [#allocation3], 32  }
 0x2bb   :  { %750 = vsyncadd [#allocation3], 4294967264 }
 0x2bc   :  { %562 = vsyncpa [#allocation3], 1 }

</bundles_post_ra>
